<compile_context>
chip_gen: v6e
topology: v6e:2x2x1
jax: 0.10.0
libtpu: 0.0.40
codegen_flags: <defaults>
</compile_context>

<pallas_src>
import jax
import jax.numpy as jnp
from jax.experimental import pallas as pl
from jax.experimental.pallas import tpu as pltpu

_EPSILON = 0.001

# Target resident bytes per streaming block (keeps 2 in + 2 out double-buffered
# blocks well under the scoped VMEM limit on v5e/v6e/v7x).
_TARGET_BLOCK_BYTES = 2 * 1024 * 1024


# ----------------------------- Pallas kernel ------------------------------- #

def _add_vec_kernel(x_ref, vec_ref, o_ref):
    # x_ref:   (tb, D) tile, caller dtype
    # vec_ref: (1, D)  f32 per-feature vector, broadcast over sublanes
    # o_ref:   (tb, D) tile, caller dtype
    x = x_ref[...].astype(jnp.float32)
    o_ref[...] = (x + vec_ref[...]).astype(o_ref.dtype)


# ------------------------------ JAX wrapper -------------------------------- #

class NormalizerBernoulliPallas:
    """JAX/Pallas port of model/Normalizer.py::NormalizerBernoulli."""

    def __init__(self, offset):
        off = jnp.asarray(offset, dtype=jnp.float32)
        off = jnp.clip(off, _EPSILON, 1.0 - _EPSILON).reshape(1, -1)
        self.offset = off
        # Precompute both per-feature vectors once; kernels become a pure add.
        self.neg_offset = -off
        self.log_offset = jnp.log(off / (1.0 - off))

    # TODO(synk): forward() intentionally raises in the PyTorch module; not ported.

    @staticmethod
    def _pick_batch_tile(B, D, itemsize):
        """Batch tile: ~_TARGET_BLOCK_BYTES, multiple of the dtype's sublane tile."""
        # Sublane tile is 8 for 32-bit, 16 for 16-bit, 32 for 8-bit dtypes.
        sub = 8 * max(1, 4 // max(1, itemsize))
        rows = _TARGET_BLOCK_BYTES // max(1, D * itemsize)
        rows = max(sub, (rows // sub) * sub)
        if rows >= B:
            return B            # whole batch fits in one block (full-dim block)
        return rows             # multiple of the sublane tile; last grid block masked

    def _add_vec(self, x, vec):
        x = jnp.asarray(x)
        orig_shape = x.shape
        D = self.offset.shape[1]
        x2 = x.reshape(-1, orig_shape[-1])
        assert x2.shape[-1] == D, "last dim must match offset feature count"
        B = x2.shape[0]

        tb = self._pick_batch_tile(B, D, x2.dtype.itemsize)
        grid = (pl.cdiv(B, tb),)

        out = pl.pallas_call(
            _add_vec_kernel,
            out_shape=jax.ShapeDtypeStruct((B, D), x2.dtype),
            grid_spec=pl.GridSpec(
                grid=grid,
                in_specs=[
                    pl.BlockSpec((tb, D), lambda i: (i, 0)),
                    pl.BlockSpec((1, D), lambda i: (0, 0)),   # resident vector
                ],
                out_specs=pl.BlockSpec((tb, D), lambda i: (i, 0)),
            ),
            compiler_params=pltpu.CompilerParams(
                dimension_semantics=("parallel",),
            ),
        )(x2, vec)
        return out.reshape(orig_shape)

    def normalize(self, data):
        # data - offset
        return self._add_vec(data, self.neg_offset)

    def unnormalize_logits(self, logits):
        # Adjusted Bernoulli logits: logits + log(offset / (1 - offset)).
        # The tdist.Bernoulli wrapper is parameter bookkeeping around this tensor.
        return self._add_vec(logits, self.log_offset)


# ---------------------------------- main ------------------------------------ #

if __name__ == "__main__":
    key = jax.random.PRNGKey(0)
    k_off, k_data, k_logits = jax.random.split(key, 3)

    B, D = 8, 128  # small demo shapes: batch=8, features=128 (lane-aligned)

    offset = jax.random.uniform(k_off, (D,), dtype=jnp.float32)
    data = jax.random.normal(k_data, (B, D), dtype=jnp.float32)
    logits = jax.random.normal(k_logits, (B, D), dtype=jnp.float32)

    norm = NormalizerBernoulliPallas(offset)

    y_norm = jax.block_until_ready(norm.normalize(data))
    y_unnorm = jax.block_until_ready(norm.unnormalize_logits(logits))

    # Reference (plain JAX) checks, matching the PyTorch semantics.
    off_clamped = jnp.clip(offset, _EPSILON, 1.0 - _EPSILON)[None, :]
    ref_norm = data - off_clamped
    ref_unnorm = logits + jnp.log(off_clamped / (1.0 - off_clamped))

    assert y_norm.dtype == data.dtype
    assert y_unnorm.dtype == logits.dtype
    assert jnp.allclose(y_norm, ref_norm, atol=1e-5, rtol=1e-5)
    assert jnp.allclose(y_unnorm, ref_unnorm, atol=1e-5, rtol=1e-5)

    print("KERNEL_OK")
</pallas_src>

<mosaic_0001>
module attributes {stable_mosaic.version = 11 : i64} {
  func.func @_add_vec_kernel(%arg0: i32, %arg1: memref<8x128xf32, #tpu.memory_space<vmem>>, %arg2: memref<1x128xf32, #tpu.memory_space<vmem>>, %arg3: memref<8x128xf32, #tpu.memory_space<vmem>>) attributes {dimension_semantics = [#tpu.dimension_semantics<parallel>], iteration_bounds = array<i64: 1>, scalar_prefetch = 0 : i64, scratch_operands = 0 : i64, tpu.core_type = #tpu.core_type<tc>, window_params = [{transform_indices = @transform_0, window_bounds = array<i64: 8, 128>}, {pipeline_mode = #tpu.pipeline_mode<synchronous>, transform_indices = @transform_1, window_bounds = array<i64: 1, 128>}, {transform_indices = @transform_2, window_bounds = array<i64: 8, 128>}]} {
    %c0 = arith.constant 0 : index
    %c0_0 = arith.constant 0 : index
    %0 = vector.load %arg1[%c0, %c0_0] : memref<8x128xf32, #tpu.memory_space<vmem>>, vector<8x128xf32>
    %c0_1 = arith.constant 0 : index
    %c0_2 = arith.constant 0 : index
    %1 = vector.load %arg2[%c0_1, %c0_2] : memref<1x128xf32, #tpu.memory_space<vmem>>, vector<1x128xf32>
    %2 = vector.broadcast %1 : vector<1x128xf32> to vector<8x128xf32>
    %3 = arith.addf %0, %2 : vector<8x128xf32>
    %c0_3 = arith.constant 0 : index
    %c0_4 = arith.constant 0 : index
    %4 = vector.load %arg3[%c0_3, %c0_4] : memref<8x128xf32, #tpu.memory_space<vmem>>, vector<8x128xf32>
    tpu.vector_store %arg3[%c0_3, %c0_4], %3 {strides = array<i32>} : memref<8x128xf32, #tpu.memory_space<vmem>>, vector<8x128xf32>,
    return
  }
  func.func @transform_0(%arg0: i32) -> (i32, i32) {
    %c0_i32 = arith.constant 0 : i32
    %c0_i32_0 = arith.constant 0 : i32
    return %arg0, %c0_i32 : i32, i32
  }
  func.func @transform_1(%arg0: i32) -> (i32, i32) {
    %c0_i32 = arith.constant 0 : i32
    %c0_i32_0 = arith.constant 0 : i32
    %c0_i32_1 = arith.constant 0 : i32
    return %c0_i32, %c0_i32_0 : i32, i32
  }
  func.func @transform_2(%arg0: i32) -> (i32, i32) {
    %c0_i32 = arith.constant 0 : i32
    %c0_i32_0 = arith.constant 0 : i32
    return %arg0, %c0_i32 : i32, i32
  }
}

</mosaic_0001>

<bundles_post_ra>
// kernel: tpu_custom_call.1
= control target key start
LH: loop header
LB: loop body
LE: loop exit
PB: predicated region body
PF: predicated region fallthrough
CT: control target
= control target key end

     0   :  { %7 = vsyncpa [#allocation3], 0  ;;  %s122_s0 = inlined_call_operand.hbm [shape: f32[8,128], index: 0, kind: input, shape index: {}]   ;;  %s123_s1 = inlined_call_operand.vmem [shape: f32[1,128], index: 1, kind: input, shape index: {}]   ;;  %s124_s2 = inlined_call_operand.hbm [shape: f32[8,128], index: 2, kind: output, shape index: {}]  }
   0x1   :  { %8 = vsyncpa [#allocation4], 0  ;;  %s96_s9 = smov [#allocation2]  }
   0x2   :  { %s15_s10 = sshll.u32 %s96_s9, 4  ;;  %s16_s10 = int_to_ptr.vmem [resolvable:$true] %s15_s10 }
   0x3   :  { %s60_s11 = scalar_lea.vmem %s16_s10, 128  ;;  %p65_p1 = scmp.lt.s32.totalorder %s16_s10, %s16_s10 }
   0x4   :  { %p61_p0 = scmp.ne.s32.totalorder %s16_s10, %s60_s11  ;;  %p66_p2 = scmp.lt.s32.totalorder %s60_s11, %s60_s11 }
   0x6   :  { %p67_p3 = por %p66_p2, %p65_p1 }
   0x8   :  { %p68_p4 = pnand %p67_p3, %p61_p0 }
   0xa   :  { %71 = shalt.err (!%p68_p4)
}
   0xb   :  { %18 = dma.hbm_to_vmem [thread:$0]  %s122_s0, 128, %s16_s10, [#allocation3]  }
   0xc   :  { %92 = dma.done.wait [#allocation3], 128  }
   0xd   :  { %93 = vsyncadd [#allocation3], 4294967168  ;;  %s97_s14 = smov [#allocation5]   ;;  %v24_v0 = vld [vmem:[#allocation2] sm:$0xff] }
   0xe   :  { %s40_s15 = sshll.u32 %s97_s14, 4  ;;  %v49_v1 = vld [vmem:[%s123_s1] ss:$0 sm:$0xff]  ;;  %s41_s15 = int_to_ptr.vmem [resolvable:$true] %s40_s15 }
   0xf   :  { %v32_v2 = vadd.f32 %v49_v1, %v24_v0  ;;  %s72_s18 = scalar_lea.vmem %s41_s15, 128  ;;  %p77_p6 = scmp.lt.s32.totalorder %s41_s15, %s41_s15 }
  0x10   :  { %p73_p5 = scmp.ne.s32.totalorder %s41_s15, %s72_s18  ;;  %p78_p7 = scmp.lt.s32.totalorder %s72_s18, %s72_s18 }
  0x11   :  { %33 = vst [vmem:[#allocation5] sm:$0xff] %v32_v2 }
  0x12   :  { %p79_p8 = por %p78_p7, %p77_p6 }
  0x14   :  { %p80_p9 = pnand %p79_p8, %p73_p5 }
  0x16   :  { %83 = shalt.err (!%p80_p9)
}
  0x17   :  { %43 = dma.vmem_to_hbm [thread:$0]  %s41_s15, 128, %s124_s2, [#allocation4]  }
  0x18   :  { %94 = dma.done.wait [#allocation4], 128  }
  0x19   :  { %95 = vsyncadd [#allocation4], 4294967168 }
  0x1a   :  { %47 = vsyncpa [#allocation3], 1 }
  0x1b   :  { %48 = vsyncpa [#allocation4], 1 }

</bundles_post_ra>
